<compile_context>
chip_gen: v6e
topology: v6e:2x2x1
jax: 0.10.0
libtpu: 0.0.40
codegen_flags: <defaults>
</compile_context>

<pallas_src>
import functools

import jax
import jax.numpy as jnp
import numpy as np
from jax import lax
from jax.experimental import pallas as pl
from jax.experimental.pallas import tpu as pltpu

EPS = 1e-12


# ---------------------------------------------------------------------------
# Spectral-norm power iteration (plain jnp/XLA — the matrix is 8 x 36; a
# standalone pallas_call here is pure dispatch latency, per the perf review).
# ---------------------------------------------------------------------------
def _l2normalize(a, eps=EPS):
    return a / (jnp.linalg.norm(a) + eps)


def spectral_norm_stats(w_bar, u, v, power_iterations=1):
    """Torch-equivalent power iteration. Returns (sigma, u_new, v_new)."""
    c_out = w_bar.shape[0]
    w_mat = w_bar.reshape(c_out, -1).astype(jnp.float32)
    u = u.astype(jnp.float32)
    v = v.astype(jnp.float32)
    for _ in range(power_iterations):
        v = _l2normalize(w_mat.T @ u)
        u = _l2normalize(w_mat @ v)
    sigma = u @ (w_mat @ v)
    return sigma, u, v


# ---------------------------------------------------------------------------
# Conv2d as a single lane-dense matmul over a pre-packed im2col slab.
#   x_ref : (tm, K)        bf16  im2col rows (K = kh*kw*C_in)
#   w_ref : (K, C_out_p)   bf16  weight, lane-padded output channels
#   b_ref : (1, C_out_p)   f32   bias
#   o_ref : (tm, C_out_p)  f32
# ---------------------------------------------------------------------------
def _conv_mm_kernel(x_ref, w_ref, b_ref, o_ref):
    acc = jnp.dot(x_ref[...], w_ref[...], preferred_element_type=jnp.float32)
    o_ref[...] = (acc + b_ref[...]).astype(o_ref.dtype)


def _round_up(x, m):
    return ((x + m - 1) // m) * m


def _vmem_limit_bytes():
    """Per-generation scoped-VMEM limit: ~3/4 of physical, capped at 96 MiB.
    (v7x: 64 MiB physical -> 48 MiB; v5e/v6e: 128 MiB -> 96 MiB)."""
    phys = 128 * 1024 * 1024
    try:
        info = pltpu.get_tpu_info()
        phys = int(getattr(info, "vmem_capacity_bytes", phys))
    except Exception:
        pass
    return min(96 * 1024 * 1024, (phys * 3) // 4)


def _pick_row_tile(rows_total, k, c_out_p, vmem_budget):
    """Largest row tile (multiple of 8) whose double-buffered blocks fit the
    VMEM budget while still giving >= 4 parallel grid blocks (megacore)."""
    for tm in (512, 256, 128):
        need = (2 * tm * k * 2            # double-buffered bf16 activation block
                + 2 * tm * c_out_p * 4    # double-buffered f32 output block
                + k * c_out_p * 2         # resident bf16 weight
                + c_out_p * 4)            # bias
        if need <= vmem_budget and pl.cdiv(rows_total, tm) >= 4:
            return tm
    return 128


def conv2d_spectral_pallas(x_nchw, w_norm, bias, pad):
    n, c_in, h, w = x_nchw.shape
    c_out, _, kh, kw = w_norm.shape
    h_out = h + 2 * pad - kh + 1
    w_out = w + 2 * pad - kw + 1
    k = kh * kw * c_in

    # Lane-dense output channels: 128 for small C_out; multiples of 256 above
    # that (fills the 256-wide v6e/v7x MXU; on v5e it is two 128 passes either
    # way, so this costs nothing there).
    c_out_p = 128 if c_out <= 128 else _round_up(c_out, 256)

    # --- wrapper-side im2col (C_in is small): rows are (ki, kj, c)-ordered ---
    x_nhwc = jnp.transpose(x_nchw, (0, 2, 3, 1))
    xpad = jnp.pad(x_nhwc, ((0, 0), (pad, pad), (pad, pad), (0, 0)))
    taps = [xpad[:, ki:ki + h_out, kj:kj + w_out, :]
            for ki in range(kh) for kj in range(kw)]
    x_col = jnp.concatenate(taps, axis=-1).reshape(n * h_out * w_out, k)
    x_col = x_col.astype(jnp.bfloat16)

    # Weight in matching (ki, kj, c_in) -> K order, lane-padded C_out, bf16.
    w_mat = jnp.transpose(w_norm, (2, 3, 1, 0)).reshape(k, c_out)
    w_mat = jnp.pad(w_mat, ((0, 0), (0, c_out_p - c_out))).astype(jnp.bfloat16)
    b_p = jnp.pad(bias.astype(jnp.float32),
                  (0, c_out_p - c_out)).reshape(1, c_out_p)

    rows_total = n * h_out * w_out
    vmem_limit = _vmem_limit_bytes()
    tm = _pick_row_tile(rows_total, k, c_out_p, vmem_limit // 2)
    rows_pad = _round_up(rows_total, tm)
    if rows_pad != rows_total:
        x_col = jnp.pad(x_col, ((0, rows_pad - rows_total), (0, 0)))

    # K fits in a single block for any realistic C_in*kh*kw; a K grid axis
    # (with an f32 VMEM accumulator) would only be needed for K >> 4096.
    out = pl.pallas_call(
        _conv_mm_kernel,
        out_shape=jax.ShapeDtypeStruct((rows_pad, c_out_p), jnp.float32),
        grid_spec=pltpu.PrefetchScalarGridSpec(
            num_scalar_prefetch=0,
            grid=(rows_pad // tm,),
            in_specs=[
                pl.BlockSpec((tm, k), lambda i: (i, 0)),          # im2col rows
                pl.BlockSpec((k, c_out_p), lambda i: (0, 0)),     # weight (resident)
                pl.BlockSpec((1, c_out_p), lambda i: (0, 0)),     # bias (resident)
            ],
            out_specs=pl.BlockSpec((tm, c_out_p), lambda i: (i, 0)),
        ),
        compiler_params=pltpu.CompilerParams(
            dimension_semantics=("parallel",),
            vmem_limit_bytes=vmem_limit),
    )(x_col, w_mat, b_p)

    # Drop row/channel padding, back to NCHW (PyTorch convention).
    y = out[:rows_total, :c_out].reshape(n, h_out, w_out, c_out)
    return jnp.transpose(y, (0, 3, 1, 2))


# ---------------------------------------------------------------------------
# SpectralNorm(Conv2d) forward
# ---------------------------------------------------------------------------
def spectral_norm_conv_forward(x_nchw, w_bar, bias, u, v,
                               power_iterations=1, pad=1):
    sigma, u_new, v_new = spectral_norm_stats(w_bar, u, v, power_iterations)
    # Normalize in f32 first (torch order: weight = w_bar / sigma), then the
    # conv wrapper casts the normalized weight to bf16 for the MXU.
    w_norm = w_bar.astype(jnp.float32) / sigma
    y = conv2d_spectral_pallas(x_nchw, w_norm, bias, pad)
    return y, u_new, v_new


if __name__ == "__main__":
    # Wrapped module: Conv2d(in=4, out=8, kernel=3, padding=1), input NCHW.
    N, C_IN, H, W = 2, 4, 16, 16
    C_OUT, KH, KW = 8, 3, 3

    key = jax.random.PRNGKey(0)
    k_w, k_b, k_u, k_v, k_x = jax.random.split(key, 5)

    w_bar = jax.random.normal(k_w, (C_OUT, C_IN, KH, KW), jnp.float32) * 0.1
    bias = jax.random.normal(k_b, (C_OUT,), jnp.float32) * 0.1
    # _make_params(): u, v ~ N(0,1), l2-normalized once at construction.
    u0 = _l2normalize(jax.random.normal(k_u, (C_OUT,), jnp.float32))
    v0 = _l2normalize(jax.random.normal(k_v, (C_IN * KH * KW,), jnp.float32))
    x = jax.random.normal(k_x, (N, C_IN, H, W), jnp.float32)

    fwd = jax.jit(functools.partial(spectral_norm_conv_forward,
                                    power_iterations=1, pad=1))
    y, u_new, v_new = fwd(x, w_bar, bias, u0, v0)
    y = jax.block_until_ready(y)

    # Reference: float64 power iteration (numpy) + full-precision conv.
    w_mat_np = np.asarray(w_bar, np.float64).reshape(C_OUT, -1)
    u_np = np.asarray(u0, np.float64)
    v_np = w_mat_np.T @ u_np
    v_np = v_np / (np.linalg.norm(v_np) + EPS)
    u_np = w_mat_np @ v_np
    u_np = u_np / (np.linalg.norm(u_np) + EPS)
    sigma_np = float(u_np @ (w_mat_np @ v_np))
    w_norm_ref = (np.asarray(w_bar, np.float64) / sigma_np).astype(np.float32)

    y_ref = lax.conv_general_dilated(
        x, jnp.asarray(w_norm_ref), window_strides=(1, 1),
        padding=((1, 1), (1, 1)),
        dimension_numbers=("NCHW", "OIHW", "NCHW"),
        precision=lax.Precision.HIGHEST) + bias[None, :, None, None]

    assert y.shape == (N, C_OUT, H, W)
    # bf16 MXU inputs -> relaxed tolerance on the conv output.
    np.testing.assert_allclose(np.asarray(y), np.asarray(y_ref),
                               rtol=2e-2, atol=2e-2)
    np.testing.assert_allclose(np.asarray(u_new), u_np.astype(np.float32),
                               rtol=5e-3, atol=5e-3)
    np.testing.assert_allclose(np.asarray(v_new), v_np.astype(np.float32),
                               rtol=5e-3, atol=5e-3)
    print("KERNEL_OK")
</pallas_src>

<mosaic_0001>
module attributes {stable_mosaic.version = 11 : i64} {
  func.func @_conv_mm_kernel(%arg0: i32, %arg1: memref<128x36xbf16, #tpu.memory_space<vmem>>, %arg2: memref<36x128xbf16, #tpu.memory_space<vmem>>, %arg3: memref<1x128xf32, #tpu.memory_space<vmem>>, %arg4: memref<128x128xf32, #tpu.memory_space<vmem>>) attributes {dimension_semantics = [#tpu.dimension_semantics<parallel>], iteration_bounds = array<i64: 4>, scalar_prefetch = 0 : i64, scratch_operands = 0 : i64, tpu.core_type = #tpu.core_type<tc>, window_params = [{transform_indices = @transform_0, window_bounds = array<i64: 128, 36>}, {pipeline_mode = #tpu.pipeline_mode<synchronous>, transform_indices = @transform_1, window_bounds = array<i64: 36, 128>}, {pipeline_mode = #tpu.pipeline_mode<synchronous>, transform_indices = @transform_2, window_bounds = array<i64: 1, 128>}, {transform_indices = @transform_3, window_bounds = array<i64: 128, 128>}]} {
    %c0 = arith.constant 0 : index
    %c0_0 = arith.constant 0 : index
    %0 = vector.load %arg1[%c0, %c0_0] : memref<128x36xbf16, #tpu.memory_space<vmem>>, vector<128x36xbf16>
    %c0_1 = arith.constant 0 : index
    %c0_2 = arith.constant 0 : index
    %1 = vector.load %arg2[%c0_1, %c0_2] : memref<36x128xbf16, #tpu.memory_space<vmem>>, vector<36x128xbf16>
    %cst = arith.constant dense<0.000000e+00> : vector<128x128xf32>
    %2 = tpu.matmul %0, %1, %cst {dimension_numbers = #tpu.dot_dimension_numbers<[1], [0], [0], [1], [0, 0, 1, 1], [], []>} : vector<128x36xbf16>, vector<36x128xbf16>, vector<128x128xf32> -> vector<128x128xf32>
    %c0_3 = arith.constant 0 : index
    %c0_4 = arith.constant 0 : index
    %3 = vector.load %arg3[%c0_3, %c0_4] : memref<1x128xf32, #tpu.memory_space<vmem>>, vector<1x128xf32>
    %4 = vector.broadcast %3 : vector<1x128xf32> to vector<128x128xf32>
    %5 = arith.addf %2, %4 : vector<128x128xf32>
    %c0_5 = arith.constant 0 : index
    %c0_6 = arith.constant 0 : index
    %6 = vector.load %arg4[%c0_5, %c0_6] : memref<128x128xf32, #tpu.memory_space<vmem>>, vector<128x128xf32>
    tpu.vector_store %arg4[%c0_5, %c0_6], %5 {strides = array<i32>} : memref<128x128xf32, #tpu.memory_space<vmem>>, vector<128x128xf32>,
    return
  }
  func.func @transform_0(%arg0: i32) -> (i32, i32) {
    %c0_i32 = arith.constant 0 : i32
    %c0_i32_0 = arith.constant 0 : i32
    return %arg0, %c0_i32 : i32, i32
  }
  func.func @transform_1(%arg0: i32) -> (i32, i32) {
    %c0_i32 = arith.constant 0 : i32
    %c0_i32_0 = arith.constant 0 : i32
    %c0_i32_1 = arith.constant 0 : i32
    return %c0_i32, %c0_i32_0 : i32, i32
  }
  func.func @transform_2(%arg0: i32) -> (i32, i32) {
    %c0_i32 = arith.constant 0 : i32
    %c0_i32_0 = arith.constant 0 : i32
    %c0_i32_1 = arith.constant 0 : i32
    return %c0_i32, %c0_i32_0 : i32, i32
  }
  func.func @transform_3(%arg0: i32) -> (i32, i32) {
    %c0_i32 = arith.constant 0 : i32
    %c0_i32_0 = arith.constant 0 : i32
    return %arg0, %c0_i32 : i32, i32
  }
}

</mosaic_0001>

<bundles_post_ra>
// kernel: spectral_norm_conv_forward.1
= control target key start
LH: loop header
LB: loop body
LE: loop exit
PB: predicated region body
PF: predicated region fallthrough
CT: control target
= control target key end

     0   :  { %s575_s12 = smov 0   ;;  %s634_s0 = inlined_call_operand.vmem [shape: bf16[512,36], index: 0, kind: input, shape index: {}]   ;;  %s635_s1 = inlined_call_operand.vmem [shape: bf16[36,128], index: 1, kind: input, shape index: {}]   ;;  %s636_s2 = inlined_call_operand.vmem [shape: f32[1,128], index: 2, kind: input, shape index: {}]   ;;  %s637_s3 = inlined_call_operand.vmem [shape: f32[512,128], index: 3, kind: output, shape index: {}]  }
   0x1 LB: > { %s456_s13 = sadd.s32 4294967295, %s553_s12   ;;  %p460_p0 = scmp.ge.s32.totalorder %s553_s12, 1  ;;  %s553_s12 = sphi %s575_s12, %s13_s12  }
   0x2   : > { %p138_p1 = scmp.lt.s32.totalorder %s553_s12, 5 }
   0x4   : > { %p139_p2 = pnand %p460_p0, %p138_p1 }
   0x5   : > { %s461_s18 = sshll.u32 (!%p139_p2), %s456_s13, 4 }
   0x6   : > { %142 = sbr.rel (%p139_p2) target bundleno = 234 (0xea), region = 32  ;;  %p163_p3 = scmp.lt.s32.totalorder (!%p139_p2), %s461_s18, 63 }
   0xb   : > { %v536_v0 = vld [vmem:[%s635_s1 + $0x10] ss:$0 sps:$4 sm:$0x33]   ;;  %vm283_vm0 = vcmask 1041408   ;;  %v537_v1 = vld [vmem:[%s635_s1 + $0x8] sm:$0xff]   ;;  %v538_v3 = vld [vmem:[%s635_s1] sm:$0xff]  }
   0xc   : > { %526 = vmatprep.subr.msk.bf16.mxu0 %vm283_vm0, %v536_v0  ;;  %527 = vmatprep.subr.msk.bf16.mxu1 %vm283_vm0, %v536_v0  ;;  %v285_v2 = vsel %vm283_vm0, %v536_v0, 0  ;;  %s639_s18 = smov (!%p163_p3, %s461_s18), 63  ;;  %vm258_vm1 = vcmask 293888   ;;  %v465_v12 = vld [vmem:[%s636_s2] ss:$0 sm:$0xff] }
   0xd   : > { %499 = vmatpush3.bf16.msra.mxu0 %v285_v2  ;;  %523 = vmatpush3.bf16.msra.mxu1 %v285_v2  ;;  %s462_s21 = sshll.u32 %s639_s18, 2  ;;  %s464_s25 = sshll.u32 %s639_s18, 3 }
   0xe   : > { %500 = vmatprep.subr.bf16.mxu0 %v537_v1  ;;  %521 = vmatprep.subr.bf16.mxu1 %v537_v1  ;;  %s166_s24 = scalar_lea.vmem %s634_s0, %s462_s21  ;;  %s613_s30 = scalar_lea.vmem %s637_s3, %s464_s25 }
   0xf   : > { %v539_v4 = vld [vmem:[%s166_s24] sm:$0xff]   ;;  %v541_v6 = vld [vmem:[%s166_s24 + $0x8] sm:$0xff]   ;;  %v543_v8 = vld [vmem:[%s166_s24 + $0x10] sm:$0xff]  }
  0x10   : > { %v540_v5 = vld [vmem:[%s166_s24 + $0x20] sm:$0xff]   ;;  %504 = vmatprep.mubr.msk.bf16.mxu0 %vm258_vm1, %v539_v4  ;;  %v542_v7 = vld [vmem:[%s166_s24 + $0x28] sm:$0xff]   ;;  %v544_v9 = vld [vmem:[%s166_s24 + $0x30] sm:$0xff]  }
  0x11   : > { %501 = vmatpush3.bf16.msra.mxu0 %v537_v1  ;;  %524 = vmatpush3.bf16.msra.mxu1 %v537_v1  ;;  %v545_v10 = vld [vmem:[%s166_s24 + $0x18] sm:$0xff]  }
  0x12   : > { %502 = vmatprep.subr.bf16.mxu0 %v538_v3  ;;  %522 = vmatprep.subr.bf16.mxu1 %v538_v3  ;;  %v546_v11 = vld [vmem:[%s166_s24 + $0x38] sm:$0xff]  }
  0x13   : > { %512 = vmatprep.mubr.msk.bf16.mxu1 %vm258_vm1, %v540_v5 }
  0x15   : > { %503 = vmatpush3.bf16.msra.mxu0 %v538_v3  ;;  %525 = vmatpush3.bf16.msra.mxu1 %v538_v3 }
  0x18   : > { %505 = vmatmul.mubr.msk.bf16.vlgmr.msra.gmra.mxu0 %vm258_vm1, %v541_v6  ;;  %513 = vmatmul.mubr.msk.bf16.vlgmr.msra.gmra.mxu1 %vm258_vm1, %v542_v7 }
  0x19   : > { %508 = vmatprep.mubr.msk.bf16.mxu0 %vm258_vm1, %v543_v8  ;;  %516 = vmatprep.mubr.msk.bf16.mxu1 %vm258_vm1, %v544_v9 }
  0x20   : > { %509 = vmatmul.mubr.msk.bf16.gmra.mxu0 %vm258_vm1, %v545_v10  ;;  %517 = vmatmul.mubr.msk.bf16.gmra.mxu1 %vm258_vm1, %v546_v11 }
  0xd8   : > { %v506_v13 = vpop.f32.mrf.mxu0  ;;  %v514_v14 = vpop.f32.mrf.mxu1 }
  0xd9   : > { %v330_v15 = vadd.f32 %v506_v13, %v465_v12  ;;  %v362_v16 = vadd.f32 %v514_v14, %v465_v12 }
  0xda   : > { %v321_v17 = vpop.f32.mrf.mxu0  ;;  %v353_v18 = vpop.f32.mrf.mxu1 }
  0xdb   : > { %386 = vst [vmem:[%s613_s30 + $0x10] sm:$0xff] %v330_v15  ;;  %394 = vst [vmem:[%s613_s30 + $0x50] sm:$0xff] %v362_v16  ;;  %v322_v19 = vadd.f32 %v465_v12, %v321_v17  ;;  %v354_v20 = vadd.f32 %v465_v12, %v353_v18 }
  0xdc   : > { %v507_v21 = vpop.f32.mrf.mxu0  ;;  %v515_v22 = vpop.f32.mrf.mxu1 }
  0xdd   : > { %384 = vst [vmem:[%s613_s30] sm:$0xff] %v322_v19  ;;  %392 = vst [vmem:[%s613_s30 + $0x40] sm:$0xff] %v354_v20  ;;  %v333_v23 = vadd.f32 %v507_v21, %v465_v12  ;;  %v365_v24 = vadd.f32 %v515_v22, %v465_v12 }
  0xde   : > { %v324_v25 = vpop.f32.mrf.mxu0  ;;  %v356_v26 = vpop.f32.mrf.mxu1 }
  0xdf   : > { %387 = vst [vmem:[%s613_s30 + $0x18] sm:$0xff] %v333_v23  ;;  %395 = vst [vmem:[%s613_s30 + $0x58] sm:$0xff] %v365_v24  ;;  %v325_v27 = vadd.f32 %v465_v12, %v324_v25  ;;  %v357_v28 = vadd.f32 %v465_v12, %v356_v26 }
  0xe0   : > { %v510_v29 = vpop.f32.mrf.mxu0  ;;  %v518_v30 = vpop.f32.mrf.mxu1 }
  0xe1   : > { %385 = vst [vmem:[%s613_s30 + $0x8] sm:$0xff] %v325_v27  ;;  %393 = vst [vmem:[%s613_s30 + $0x48] sm:$0xff] %v357_v28  ;;  %v346_v31 = vadd.f32 %v510_v29, %v465_v12  ;;  %v378_v32 = vadd.f32 %v518_v30, %v465_v12 }
  0xe2   : > { %v337_v33 = vpop.f32.mrf.mxu0  ;;  %v369_v34 = vpop.f32.mrf.mxu1 }
  0xe3   : > { %390 = vst [vmem:[%s613_s30 + $0x30] sm:$0xff] %v346_v31  ;;  %398 = vst [vmem:[%s613_s30 + $0x70] sm:$0xff] %v378_v32  ;;  %v338_v35 = vadd.f32 %v465_v12, %v337_v33  ;;  %v370_v36 = vadd.f32 %v465_v12, %v369_v34 }
  0xe4   : > { %v511_v37 = vpop.f32.mrf.mxu0  ;;  %v519_v38 = vpop.f32.mrf.mxu1 }
  0xe5   : > { %388 = vst [vmem:[%s613_s30 + $0x20] sm:$0xff] %v338_v35  ;;  %396 = vst [vmem:[%s613_s30 + $0x60] sm:$0xff] %v370_v36  ;;  %v349_v39 = vadd.f32 %v511_v37, %v465_v12  ;;  %v381_v40 = vadd.f32 %v519_v38, %v465_v12 }
  0xe6   : > { %v340_v41 = vpop.f32.mrf.mxu0  ;;  %v372_v42 = vpop.f32.mrf.mxu1 }
  0xe7   : > { %391 = vst [vmem:[%s613_s30 + $0x38] sm:$0xff] %v349_v39  ;;  %399 = vst [vmem:[%s613_s30 + $0x78] sm:$0xff] %v381_v40  ;;  %v341_v43 = vadd.f32 %v465_v12, %v340_v41  ;;  %v373_v44 = vadd.f32 %v465_v12, %v372_v42 }
  0xe9   : > { %389 = vst [vmem:[%s613_s30 + $0x28] sm:$0xff] %v341_v43  ;;  %397 = vst [vmem:[%s613_s30 + $0x68] sm:$0xff] %v373_v44 }
  0xea PF: > { %s13_s12 = sadd.s32 1, %s553_s12  }
  0xeb   : > { %p10_p4 = scmp.ge.s32.totalorder %s13_s12, 6  }
  0xed   :  { %12 = sbr.rel (!%p10_p4) target bundleno = 1 (0x1), region = 62 }

</bundles_post_ra>
